<compile_context>
chip_gen: v7x
topology: tpu7x:2x2x1
jax: 0.10.0
libtpu: 0.0.40
codegen_flags: <defaults>
</compile_context>

<pallas_src>
import functools

import numpy as np
import jax
import jax.numpy as jnp
from jax.experimental import pallas as pl
from jax.experimental.pallas import tpu as pltpu


def _patch_embed_kernel(x_ref, w_ref, pos_ref, o_ref):
    # x_ref:   (TM, patch_dim)          current (m-tile, batch) slab of patches
    # w_ref:   (patch_dim, hidden_pad)  resident projection weight
    # pos_ref: (TM, hidden_pad)         position embeddings with conv bias folded in
    # o_ref:   (TM, hidden_pad)         lane-dense output slab
    y = jnp.dot(x_ref[...], w_ref[...], preferred_element_type=jnp.float32)
    o_ref[...] = (y + pos_ref[...]).astype(o_ref.dtype)


def _round_up(x, m):
    return (x + m - 1) // m * m


def _vmem_budget_bytes():
    """Conservative budget for the double-buffered tiles + resident W."""
    try:
        cap = pltpu.get_tpu_info().vmem_capacity_bytes
    except Exception:
        cap = 64 << 20
    return min(20 << 20, max(cap // 3, 4 << 20))


def _pick_tile_m(n_patches, batch, patch_dim, hidden_pad,
                 x_bytes, pos_bytes, out_bytes, w_bytes):
    """cdiv-friendly M-tile: VMEM-budgeted, multiple of 8, capped at 512, and
    chosen so the parallel grid has >=2 steps (v7x megacore) when possible."""
    if n_patches <= 8:
        return n_patches                      # full array extent is always legal
    w_resident = 2 * patch_dim * hidden_pad * w_bytes          # double-buffered W
    per_row = 2 * (patch_dim * x_bytes + hidden_pad * (pos_bytes + out_bytes))
    avail = max(_vmem_budget_bytes() - w_resident, 8 * per_row)
    tm = min(512, avail // per_row, _round_up(n_patches, 8))
    tm = max(8, (tm // 8) * 8)
    if batch * pl.cdiv(n_patches, tm) < 2 and tm > 8:
        tm = max(8, _round_up(pl.cdiv(n_patches, 2), 8))
    return int(tm)


def prepare_patch_embedding_params(conv_w, conv_b, pos_emb, *,
                                   matmul_dtype=jnp.bfloat16):
    """One-time (per-inference-session) weight/pos prep, hoisted off the per-call
    path: conv weight [hidden, C, P, P] -> [patch_dim, hidden_pad], conv bias
    folded into the position embeddings, hidden zero-padded to a multiple of 128
    (lane-dense stores), W optionally cast to bf16 (matmul operand dtype;
    accumulation stays f32 inside the kernel)."""
    hidden = conv_w.shape[0]
    patch_dim = int(np.prod(conv_w.shape[1:]))
    w = conv_w.reshape(hidden, patch_dim).T
    pos_b = (pos_emb.reshape(-1, hidden).astype(jnp.float32)
             + conv_b[None, :].astype(jnp.float32))
    hidden_pad = _round_up(hidden, 128)
    if hidden_pad != hidden:
        w = jnp.pad(w, ((0, 0), (0, hidden_pad - hidden)))
        pos_b = jnp.pad(pos_b, ((0, 0), (0, hidden_pad - hidden)))
    if matmul_dtype is not None:
        w = w.astype(matmul_dtype)
    return w, pos_b


def patch_embedding_apply(x_nchw, w_pad, pos_pad, *, patch_size, hidden,
                          out_dtype=None, slice_to_hidden=True):
    """Per-call (x-dependent) work only.  x_nchw: [B, C, H, W];
    w_pad: [patch_dim, hidden_pad]; pos_pad: [n_patches, hidden_pad].
    Returns [B, n_patches, hidden] (or hidden_pad if slice_to_hidden=False)."""
    B, C, H, W = x_nchw.shape
    P = patch_size
    if H % P or W % P:
        raise ValueError("img dims must be divisible by patch_size (stride == kernel).")
    gh, gw = H // P, W // P
    n_patches = gh * gw
    patch_dim = C * P * P
    hidden_pad = pos_pad.shape[-1]
    assert w_pad.shape == (patch_dim, hidden_pad)
    assert pos_pad.shape == (n_patches, hidden_pad)

    out_dtype = x_nchw.dtype if out_dtype is None else out_dtype

    # Cast x to the matmul operand dtype BEFORE the im2col relayout so the
    # standalone transpose reads/writes the narrow dtype (half the HBM traffic
    # when operands are bf16) and no separate cast pass is emitted.
    x_cast = x_nchw.astype(w_pad.dtype) if x_nchw.dtype != w_pad.dtype else x_nchw

    # im2col: [B,C,H,W] -> [B, n_patches, patch_dim], (c, ph, pw) order = nn.Conv2d.
    # TODO(synk): this relayout is still a standalone memory-bound XLA op (one extra
    # HBM round-trip over x); fusing it (CompilerParams(allow_input_fusion=...) or an
    # in-kernel (C,P,W)->(gw, C*P*P) rearrange riding the idle XLU slot) is the last
    # byte-reduction item but needs Mosaic transpose-lowering validation first.
    xp = jnp.transpose(x_cast.reshape(B, C, gh, P, gw, P), (0, 2, 4, 1, 3, 5))
    xp = xp.reshape(B, n_patches, patch_dim)

    tm = _pick_tile_m(n_patches, B, patch_dim, hidden_pad,
                      jnp.dtype(xp.dtype).itemsize,
                      jnp.dtype(pos_pad.dtype).itemsize,
                      jnp.dtype(out_dtype).itemsize,
                      jnp.dtype(w_pad.dtype).itemsize)
    grid_m = pl.cdiv(n_patches, tm)   # ragged trailing block: OOB rows are masked

    grid_spec = pltpu.PrefetchScalarGridSpec(
        num_scalar_prefetch=0,
        # batch innermost: pos(+bias) block index depends only on m, so it is
        # DMA'd grid_m times (not grid_m*B); W is resident with a single DMA.
        grid=(grid_m, B),
        in_specs=[
            # x patches: squeezed batch dim -> kernel sees (tm, patch_dim)
            pl.BlockSpec((pl.Squeezed(), tm, patch_dim), lambda m, b: (b, m, 0)),
            # W: resident across the whole grid.
            # TODO(synk): pipeline_mode=pl.Buffered(1) here would drop W's second
            # (never-refetched) buffer on VMEM-tight v7x configs once validated.
            pl.BlockSpec((patch_dim, hidden_pad), lambda m, b: (0, 0)),
            # pos(+bias): depends only on the patch-tile axis
            pl.BlockSpec((tm, hidden_pad), lambda m, b: (m, 0)),
        ],
        out_specs=pl.BlockSpec((pl.Squeezed(), tm, hidden_pad),
                               lambda m, b: (b, m, 0)),
    )

    out = pl.pallas_call(
        _patch_embed_kernel,
        out_shape=jax.ShapeDtypeStruct((B, n_patches, hidden_pad), out_dtype),
        grid_spec=grid_spec,
        compiler_params=pltpu.CompilerParams(
            dimension_semantics=("parallel", "parallel"),
            vmem_limit_bytes=32 * 1024 * 1024),
        # TODO(synk): for very large hidden/patch_dim (3-D patches) tile K with an
        # f32 accumulator scratch; not needed at these sizes.
    )(xp, w_pad, pos_pad)

    if slice_to_hidden and hidden_pad != hidden:
        # Standalone copy; callers that tolerate the 128-padded hidden (typical
        # ViT hidden 384/768/1024 never pads) should pass slice_to_hidden=False.
        out = out[..., :hidden]
    # dropout_rate = 0.0 -> identity.
    return out


def patch_embedding_forward(x_nchw, conv_w, conv_b, pos_emb, patch_size, *,
                            matmul_dtype=jnp.bfloat16, out_dtype=None,
                            slice_to_hidden=True):
    """Convenience one-shot wrapper (prepare + apply).  bf16 matmul operands by
    default (~1e-2-level vs the f32 PyTorch module); pass matmul_dtype=None for
    exact parity."""
    w_pad, pos_pad = prepare_patch_embedding_params(
        conv_w, conv_b, pos_emb, matmul_dtype=matmul_dtype)
    return patch_embedding_apply(
        x_nchw, w_pad, pos_pad, patch_size=patch_size, hidden=conv_w.shape[0],
        out_dtype=out_dtype, slice_to_hidden=slice_to_hidden)


if __name__ == "__main__":
    # Module config (small): in_channels=4, img_size=(16,16), patch_size=(8,8),
    # hidden_size=32, num_heads=4, pos_embed='conv', dropout_rate=0.0, spatial_dims=2
    B, C, H, W = 2, 4, 16, 16
    P, hidden = 8, 32
    n_patches = (H // P) * (W // P)

    key = jax.random.PRNGKey(0)
    kx, kw, kb, kp, k2x, k2w, k2b, k2p = jax.random.split(key, 8)

    x = jax.random.normal(kx, (B, C, H, W), dtype=jnp.float32)
    conv_w = 0.02 * jax.random.normal(kw, (hidden, C, P, P), dtype=jnp.float32)
    conv_b = 0.01 * jax.random.normal(kb, (hidden,), dtype=jnp.float32)
    pos_emb = 0.02 * jax.random.truncated_normal(
        kp, -2.0, 2.0, (1, n_patches, hidden), dtype=jnp.float32)

    def reference(xr_in, w_in, b_in, pos_in, p):
        b, c, h, w = xr_in.shape
        hid = w_in.shape[0]
        npch = (h // p) * (w // p)
        xr = jnp.transpose(xr_in.reshape(b, c, h // p, p, w // p, p),
                           (0, 2, 4, 1, 3, 5)).reshape(b, npch, c * p * p)
        return xr @ w_in.reshape(hid, -1).T + b_in + pos_in

    ref = reference(x, conv_w, conv_b, pos_emb, P)

    # Exact-parity path (f32 matmul operands), with prep hoisted out of the jit'd
    # per-call function (only x-dependent work runs per forward).
    w_f32, pos_f32 = prepare_patch_embedding_params(conv_w, conv_b, pos_emb,
                                                    matmul_dtype=None)
    apply_f32 = jax.jit(functools.partial(patch_embedding_apply,
                                          patch_size=P, hidden=hidden))
    out = jax.block_until_ready(apply_f32(x, w_f32, pos_f32))
    assert out.shape == (B, n_patches, hidden)
    assert jnp.allclose(out, ref, atol=1e-5, rtol=1e-5), "f32 path mismatch"

    # Default path: bf16 matmul operands (f32 accumulation), one-shot wrapper.
    out_bf16 = jax.block_until_ready(
        patch_embedding_forward(x, conv_w, conv_b, pos_emb, P))
    assert out_bf16.shape == (B, n_patches, hidden)
    assert jnp.allclose(out_bf16, ref, atol=5e-2, rtol=5e-2), "bf16 path mismatch"

    # Second config: n_patches=9 (not a multiple of the tile) -> exercises the
    # cdiv grid with a ragged/masked trailing M block and a 2-step parallel m axis.
    B2, C2, H2, W2, P2, hidden2 = 1, 2, 24, 24, 8, 48
    n_patches2 = (H2 // P2) * (W2 // P2)
    x2 = jax.random.normal(k2x, (B2, C2, H2, W2), dtype=jnp.float32)
    conv_w2 = 0.02 * jax.random.normal(k2w, (hidden2, C2, P2, P2), dtype=jnp.float32)
    conv_b2 = 0.01 * jax.random.normal(k2b, (hidden2,), dtype=jnp.float32)
    pos_emb2 = 0.02 * jax.random.truncated_normal(
        k2p, -2.0, 2.0, (1, n_patches2, hidden2), dtype=jnp.float32)
    ref2 = reference(x2, conv_w2, conv_b2, pos_emb2, P2)
    out2 = jax.block_until_ready(
        patch_embedding_forward(x2, conv_w2, conv_b2, pos_emb2, P2,
                                matmul_dtype=None))
    assert out2.shape == (B2, n_patches2, hidden2)
    assert jnp.allclose(out2, ref2, atol=1e-5, rtol=1e-5), "ragged-edge path mismatch"

    print("KERNEL_OK")
</pallas_src>

<mosaic_0001>
module attributes {stable_mosaic.version = 11 : i64} {
  func.func @_patch_embed_kernel(%arg0: i32, %arg1: i32, %arg2: memref<1x4x256xf32, #tpu.memory_space<vmem>>, %arg3: memref<256x128xf32, #tpu.memory_space<vmem>>, %arg4: memref<4x128xf32, #tpu.memory_space<vmem>>, %arg5: memref<1x4x128xf32, #tpu.memory_space<vmem>>) attributes {dimension_semantics = [#tpu.dimension_semantics<parallel>, #tpu.dimension_semantics<parallel>], iteration_bounds = array<i64: 1, 2>, scalar_prefetch = 0 : i64, scratch_operands = 0 : i64, tpu.core_type = #tpu.core_type<tc>, window_params = [{transform_indices = @transform_0, window_bounds = array<i64: 1, 4, 256>}, {pipeline_mode = #tpu.pipeline_mode<synchronous>, transform_indices = @transform_1, window_bounds = array<i64: 256, 128>}, {transform_indices = @transform_2, window_bounds = array<i64: 4, 128>}, {transform_indices = @transform_3, window_bounds = array<i64: 1, 4, 128>}]} {
    %c0 = arith.constant 0 : index
    %c0_0 = arith.constant 0 : index
    %c0_1 = arith.constant 0 : index
    %0 = vector.load %arg2[%c0, %c0_0, %c0_1] : memref<1x4x256xf32, #tpu.memory_space<vmem>>, vector<1x4x256xf32>
    %1 = vector.shape_cast %0 : vector<1x4x256xf32> to vector<4x256xf32>
    %c0_2 = arith.constant 0 : index
    %c0_3 = arith.constant 0 : index
    %2 = vector.load %arg3[%c0_2, %c0_3] : memref<256x128xf32, #tpu.memory_space<vmem>>, vector<256x128xf32>
    %cst = arith.constant dense<0.000000e+00> : vector<4x128xf32>
    %3 = tpu.matmul %1, %2, %cst {dimension_numbers = #tpu.dot_dimension_numbers<[1], [0], [0], [1], [0, 0, 1, 1], [], []>} : vector<4x256xf32>, vector<256x128xf32>, vector<4x128xf32> -> vector<4x128xf32>
    %c0_4 = arith.constant 0 : index
    %c0_5 = arith.constant 0 : index
    %4 = vector.load %arg4[%c0_4, %c0_5] : memref<4x128xf32, #tpu.memory_space<vmem>>, vector<4x128xf32>
    %5 = arith.addf %3, %4 : vector<4x128xf32>
    %c0_6 = arith.constant 0 : index
    %c0_7 = arith.constant 0 : index
    %c0_8 = arith.constant 0 : index
    %6 = vector.load %arg5[%c0_6, %c0_7, %c0_8] : memref<1x4x128xf32, #tpu.memory_space<vmem>>, vector<1x4x128xf32>
    %7 = vector.shape_cast %6 : vector<1x4x128xf32> to vector<4x128xf32>
    %8 = vector.shape_cast %5 : vector<4x128xf32> to vector<1x4x128xf32>
    tpu.vector_store %arg5[%c0_6, %c0_7, %c0_8], %8 {strides = array<i32>} : memref<1x4x128xf32, #tpu.memory_space<vmem>>, vector<1x4x128xf32>,
    return
  }
  func.func @transform_0(%arg0: i32, %arg1: i32) -> (i32, i32, i32) {
    %c0_i32 = arith.constant 0 : i32
    %c0_i32_0 = arith.constant 0 : i32
    return %arg1, %arg0, %c0_i32 : i32, i32, i32
  }
  func.func @transform_1(%arg0: i32, %arg1: i32) -> (i32, i32) {
    %c0_i32 = arith.constant 0 : i32
    %c0_i32_0 = arith.constant 0 : i32
    %c0_i32_1 = arith.constant 0 : i32
    return %c0_i32, %c0_i32_0 : i32, i32
  }
  func.func @transform_2(%arg0: i32, %arg1: i32) -> (i32, i32) {
    %c0_i32 = arith.constant 0 : i32
    %c0_i32_0 = arith.constant 0 : i32
    return %arg0, %c0_i32 : i32, i32
  }
  func.func @transform_3(%arg0: i32, %arg1: i32) -> (i32, i32, i32) {
    %c0_i32 = arith.constant 0 : i32
    %c0_i32_0 = arith.constant 0 : i32
    return %arg1, %arg0, %c0_i32 : i32, i32, i32
  }
}

</mosaic_0001>

<bundles_post_ra>
// kernel: patch_embedding_apply.1
= control target key start
LH: loop header
LB: loop body
LE: loop exit
PB: predicated region body
PF: predicated region fallthrough
CT: control target
= control target key end

     0   :  { %8 = vsyncpa [#allocation3], 0  ;;  %s878_s0 = inlined_call_operand.vmem [shape: f32[2,4,256], index: 0, kind: input, shape index: {}]   ;;  %s879_s1 = inlined_call_operand.vmem [shape: f32[256,128], index: 1, kind: input, shape index: {}]   ;;  %s880_s2 = inlined_call_operand.vmem [shape: f32[4,128], index: 2, kind: input, shape index: {}]   ;;  %s881_s3 = inlined_call_operand.hbm [shape: f32[2,4,128], index: 3, kind: output, shape index: {}]  }
   0x1   :  { %10 = vsyncpa [#allocation3 + $0x1], 0  ;;  %s667_s12 = smov 0   ;;  %s669_s13 = smov 0  }
   0x2   :  { %s671_s14 = smov 0   ;;  %s673_s15 = smov 0  }
   0x3   :  { %s675_s16 = smov 0   ;;  %s677_s17 = smov 0  }
   0x4 LB: > { %s429_s18 = sadd.s32 4294967295, %s644_s17   ;;  %s430_s19 = sadd.s32 4294967294, %s644_s17   ;;  %s644_s17 = sphi %s677_s17, %s16_s17   ;;  %s640_s16 = sphi %s675_s16, %s888_s16   ;;  %s636_s15 = sphi %s673_s15, %s887_s15   ;;  %s632_s14 = sphi %s671_s14, %s886_s14   ;;  %s628_s13 = sphi %s669_s13, %s885_s13   ;;  %s624_s12 = sphi %s667_s12, %s884_s12  }
   0x5   : > { %s25_s20 = sadd.s32 1, %s640_s16  ;;  %s112_s21 = sadd.s32 1, %s632_s14 }
   0x6   : > { %p26_p0 = scmp.ge.s32.totalorder %s25_s20, 2  ;;  %p122_p1 = scmp.ne.s32.totalorder %s632_s14, %s628_s13 }
   0x7   : > { %p123_p2 = scmp.eq.s32.totalorder %s429_s18, 1  ;;  %p128_p3 = scmp.ne.s32.totalorder %s628_s13, %s624_s12 }
   0x8   : > { %s890_s20 = smov (%p26_p0, %s25_s20), 0  ;;  %p129_p5 = scmp.eq.s32.totalorder %s430_s19, 1 }
   0x9   : > { %p707_p4 = por %p123_p2, %p122_p1  ;;  %s107_s23 = ssub.s32 %s640_s16, %s890_s20 }
   0xa   : > { %p434_p6 = scmp.ge.s32.totalorder %s644_s17, 1  ;;  %p110_p7 = scmp.eq.s32.totalorder %s107_s23, 0 }
   0xb   : > { %p714_p8 = por %p129_p5, %p128_p3  ;;  %p169_p9 = scmp.lt.s32.totalorder %s644_s17, 3 }
   0xc   : > { %s720_s25 = scalar_select %p110_p7, %s632_s14, %s112_s21  }
   0xd   : > { %p170_p10 = pnand %p434_p6, %p169_p9 }
   0xe   : > { %v231_v0 = vld [vmem:[%s879_s1 + $0x80] sm:$0xff] (!%p170_p10)  ;;  %v232_v1 = vld [vmem:[%s879_s1 + $0x88] sm:$0xff] (!%p170_p10)  ;;  %p201_p11 = scmp.lt.s32.totalorder (!%p170_p10), %s636_s15, 1  ;;  %v233_v5 = vld [vmem:[%s879_s1 + $0x90] sm:$0xff] (!%p170_p10)  ;;  %s439_s5 = sshll.u32 (!%p170_p10), %s636_s15, 6 }
   0xf   : > { %173 = sbr.rel (%p170_p10) target bundleno = 280 (0x118), region = 32  ;;  %v215_v2 = vld [vmem:[%s879_s1] sm:$0xff] (!%p170_p10)  ;;  %v478_v3 = vpack.c.bf16 (!%p170_p10), %v232_v1, %v231_v0  ;;  %v216_v4 = vld [vmem:[%s879_s1 + $0x8] sm:$0xff] (!%p170_p10)  ;;  %v234_v6 = vld [vmem:[%s879_s1 + $0x98] sm:$0xff] (!%p170_p10)  ;;  %s831_s9 = scalar_lea.hbm (!%p170_p10), %s881_s3, %s439_s5 }
  0x10   : > { %v480_v7 = vpack.c.bf16 (!%p170_p10), %v216_v4, %v215_v2  ;;  %v482_v8 = vpack.c.bf16 (!%p170_p10), %v234_v6, %v233_v5  ;;  %v217_v9 = vld [vmem:[%s879_s1 + $0x10] sm:$0xff] (!%p170_p10)  ;;  %v218_v10 = vld [vmem:[%s879_s1 + $0x18] sm:$0xff] (!%p170_p10)  ;;  %v235_v11 = vld [vmem:[%s879_s1 + $0xa0] sm:$0xff] (!%p170_p10) }
  0x11   : > { %479 = vmatprep.subr.bf16.mxu0 (!%p170_p10), %v478_v3  ;;  %v236_v12 = vld [vmem:[%s879_s1 + $0xa8] sm:$0xff] (!%p170_p10)  ;;  %v484_v13 = vpack.c.bf16 (!%p170_p10), %v218_v10, %v217_v9  ;;  %v219_v15 = vld [vmem:[%s879_s1 + $0x20] sm:$0xff] (!%p170_p10)  ;;  %v237_v17 = vld [vmem:[%s879_s1 + $0xb0] sm:$0xff] (!%p170_p10) }
  0x12   : > { %481 = vmatpush3.bf16.msra.mxu0 (!%p170_p10), %v480_v7  ;;  %v486_v14 = vpack.c.bf16 (!%p170_p10), %v236_v12, %v235_v11  ;;  %v220_v16 = vld [vmem:[%s879_s1 + $0x28] sm:$0xff] (!%p170_p10)  ;;  %v238_v18 = vld [vmem:[%s879_s1 + $0xb8] sm:$0xff] (!%p170_p10)  ;;  %v221_v21 = vld [vmem:[%s879_s1 + $0x30] sm:$0xff] (!%p170_p10) }
  0x13   : > { %483 = vmatprep.subr.bf16.mxu0 (!%p170_p10), %v482_v8  ;;  %v488_v19 = vpack.c.bf16 (!%p170_p10), %v220_v16, %v219_v15  ;;  %v490_v20 = vpack.c.bf16 (!%p170_p10), %v238_v18, %v237_v17  ;;  %v222_v22 = vld [vmem:[%s879_s1 + $0x38] sm:$0xff] (!%p170_p10)  ;;  %v239_v23 = vld [vmem:[%s879_s1 + $0xc0] sm:$0xff] (!%p170_p10)  ;;  %v240_v24 = vld [vmem:[%s879_s1 + $0xc8] sm:$0xff] (!%p170_p10) }
  0x14   : > { %v492_v27 = vpack.c.bf16 (!%p170_p10), %v222_v22, %v221_v21  ;;  %v494_v28 = vpack.c.bf16 (!%p170_p10), %v240_v24, %v239_v23  ;;  %v223_v29 = vld [vmem:[%s879_s1 + $0x40] sm:$0xff] (!%p170_p10)  ;;  %v224_v30 = vld [vmem:[%s879_s1 + $0x48] sm:$0xff] (!%p170_p10)  ;;  %v241_v31 = vld [vmem:[%s879_s1 + $0xd0] sm:$0xff] (!%p170_p10) }
  0x15   : > { %v242_v32 = vld [vmem:[%s879_s1 + $0xd8] sm:$0xff] (!%p170_p10)  ;;  %v496_v33 = vpack.c.bf16 (!%p170_p10), %v224_v30, %v223_v29  ;;  %v225_v35 = vld [vmem:[%s879_s1 + $0x50] sm:$0xff] (!%p170_p10)  ;;  %v243_v37 = vld [vmem:[%s879_s1 + $0xe0] sm:$0xff] (!%p170_p10) }
  0x16   : > { %s202_s27 = scalar_select %p201_p11, %s636_s15, 1  ;;  %485 = vmatpush3.bf16.msra.mxu0 %v484_v13  ;;  %v498_v34 = vpack.c.bf16 %v242_v32, %v241_v31  ;;  %v226_v36 = vld [vmem:[%s879_s1 + $0x58] sm:$0xff]  ;;  %v244_v38 = vld [vmem:[%s879_s1 + $0xe8] sm:$0xff]  ;;  %v227_v41 = vld [vmem:[%s879_s1 + $0x60] sm:$0xff] }
  0x17   : > { %487 = vmatprep.subr.bf16.mxu0 %v486_v14  ;;  %v500_v39 = vpack.c.bf16 %v226_v36, %v225_v35  ;;  %v502_v40 = vpack.c.bf16 %v244_v38, %v243_v37  ;;  %v228_v42 = vld [vmem:[%s879_s1 + $0x68] sm:$0xff]  ;;  %v245_v43 = vld [vmem:[%s879_s1 + $0xf0] sm:$0xff]  ;;  %v246_v44 = vld [vmem:[%s879_s1 + $0xf8] sm:$0xff]  ;;  %s646_s15 = smov [#allocation2]  }
  0x18   : > { %s442_s30 = sshll.u32 %s202_s27, 3  ;;  %v504_v45 = vpack.c.bf16 %v228_v42, %v227_v41  ;;  %v506_v46 = vpack.c.bf16 %v246_v44, %v245_v43  ;;  %v229_v47 = vld [vmem:[%s879_s1 + $0x70] sm:$0xff]  ;;  %v230_v48 = vld [vmem:[%s879_s1 + $0x78] sm:$0xff]  ;;  %s198_s27 = sand.u32 1, %s628_s13   ;;  %v247_v51 = vld [vmem:[%s880_s2] sm:$0xf] }
  0x19   : > { %s209_s21 = scalar_lea.vmem %s878_s0, %s442_s30  ;;  %v508_v49 = vpack.c.bf16 %v230_v48, %v229_v47  ;;  %s435_s28 = sshll.u32 %s198_s27, 2 }
  0x1a   : > { %v214_v25 = vld [vmem:[%s209_s21] sm:$0xff]  ;;  %489 = vmatpush3.bf16.msra.mxu0 %v488_v19  ;;  %s200_s6 = scalar_lea.vmem [#allocation2], %s435_s28  ;;  %s323_s10 = scalar_lea.sflag [#allocation3], %s198_s27 }
  0x1b   : > { %v249_v26 = vcombine.high %v214_v25, %v214_v25  ;;  %491 = vmatprep.subr.bf16.mxu0 %v490_v20  ;;  %s337_s30 = sshll.u32 %s200_s6, 4  ;;  %s570_s18 = sshll.u32 %s646_s15, 4  ;;  %s833_s30 = int_to_ptr.vmem [resolvable:$true] %s337_s30  ;;  %s571_s18 = int_to_ptr.vmem [resolvable:$false] %s570_s18 }
  0x1c   : > { %s566_s11 = scalar_lea.vmem %s833_s30, 64  ;;  %s572_s19 = scalar_lea.vmem %s571_s18, 128 }
  0x1d   : > { %315 = vmatprep.mubr.f32.mxu0 %v249_v26  ;;  %p567_p12 = scmp.ne.s32.totalorder %s833_s30, %s566_s11  ;;  %p573_p1 = scmp.lt.s32.totalorder %s833_s30, %s571_s18 }
  0x1e   : > { %493 = vmatpush3.bf16.msra.mxu0 %v492_v27  ;;  %p574_p2 = scmp.lt.s32.totalorder %s572_s19, %s566_s11 }
  0x1f   : > { %495 = vmatprep.subr.bf16.mxu0 %v494_v28  ;;  %p568_p13 = pnand %p567_p12, %p707_p4 }
  0x20   : > { %p575_p3 = por %p574_p2, %p573_p1 }
  0x21   : > { %p569_p0 = pneg %p568_p13 }
  0x22   : > { %497 = vmatpush3.bf16.msra.mxu0 %v496_v33 }
  0x23   : > { %499 = vmatprep.subr.bf16.mxu0 %v498_v34  ;;  %p576_p5 = pnand %p575_p3, %p569_p0 }
  0x26   : > { %501 = vmatpush3.bf16.msra.mxu0 %v500_v39 }
  0x27   : > { %503 = vmatprep.subr.bf16.mxu0 %v502_v40 }
  0x2a   : > { %505 = vmatpush3.bf16.msra.mxu0 %v504_v45 }
  0x2b   : > { %507 = vmatprep.subr.bf16.mxu0 %v506_v46 }
  0x2e   : > { %509 = vmatpush3.bf16.msra.mxu0 %v508_v49 }
  0x31   : > { %316 = vmatmul.mubr.f32.vlgmr.msra.gmra.mrb[0].mxu0 %v214_v25 }
 0x104   : > { %v475_v50 = vpop.f32.mrb[0].mxu0 }
 0x105   : > { %v476_v52 = vpop.f32.mrb[1].mxu0 }
 0x106   : > { %v477_v53 = vadd.f32 %v476_v52, %v475_v50 }
 0x108   : > { %v318_v54 = vadd.f32 %v477_v53, %v247_v51 }
 0x10a   : > { %321 = vst [vmem:[%s200_s6] sm:$0xf] %v318_v54 }
 0x10b   : > { %579 = shalt.err (!%p576_p5)
}
 0x10c   : > { %s580_s21 = scalar_lea.hbm %s831_s9, 64  ;;  %s584_s27 = scalar_lea.hbm %s881_s3, 128 }
 0x10d   : > { %p581_p6 = scmp.ne.s32.totalorder %s831_s9, %s580_s21  ;;  %p585_p10 = scmp.lt.u32.totalorder %s831_s9, %s881_s3 }
 0x10e   : > { %p586_p11 = scmp.lt.u32.totalorder %s584_s27, %s580_s21  ;;  %p588_p13 = scmp.lt.u32.totalorder %s580_s21, %s831_s9 }
 0x10f   : > { %p582_p7 = pnand %p581_p6, %p707_p4 }
 0x110   : > { %p587_p12 = por %p586_p11, %p585_p10 }
 0x111   : > { %p583_p9 = pneg %p582_p7 }
 0x112   : > { %p589_p0 = por %p588_p13, %p587_p12 }
 0x114   : > { %p590_p1 = pnand %p589_p0, %p583_p9 }
 0x116   : > { %593 = shalt.err (!%p590_p1)
}
 0x117   : > { %510 = dma.vmem_to_hbm [thread:$0]  (%p707_p4), %s833_s30, 64, %s831_s9, %s323_s10  }
 0x118 PF: > { %p516_p2 = scmp.ge.s32.totalorder %s644_s17, 2  ;;  %s349_s4 = sand.u32 1, %s624_s12  }
 0x119   : > { %s350_s5 = scalar_lea.sflag [#allocation3], %s349_s4 }
 0x11a   : > { %p513_p3 = pnand %p516_p2, %p714_p8 }
 0x11c   : > { %619 = dma.done.wait (!%p513_p3), %s350_s5, 64  }
 0x11d   : > { %621 = vsyncadd (!%p513_p3), %s350_s5, 4294967232  ;;  %s16_s17 = sadd.s32 1, %s644_s17   ;;  %s884_s12 = smov %s628_s13 }
 0x11e   : > { %p13_p5 = scmp.ge.s32.totalorder %s16_s17, 4   ;;  %s885_s13 = smov %s632_s14 }
 0x11f   : > { %s886_s14 = smov %s720_s25  ;;  %s887_s15 = smov %s640_s16 }
 0x120   : > { %s888_s16 = smov %s890_s20  ;;  %15 = sbr.rel (!%p13_p5) target bundleno = 4 (0x4), region = 70 }
 0x127   :  { %355 = vsyncpa [#allocation3], 1 }
 0x128   :  { %357 = vsyncpa [#allocation3 + $0x1], 1 }

</bundles_post_ra>
